<compile_context>
chip_gen: v6e
topology: v6e:2x2x1
jax: 0.10.0
libtpu: 0.0.40
codegen_flags: <defaults>
</compile_context>

<pallas_src>
import functools

import jax
import jax.numpy as jnp
from jax.experimental import pallas as pl
from jax.experimental.pallas import tpu as pltpu


def _conv_bn_relu_kernel(x_ref, w_ref, shift_ref, o_ref):
    # x_ref:     (K, TM)     bf16 im2col patches (transposed, lane-dense on M)
    # w_ref:     (Cout, K)   bf16 conv weight with BN scale folded in
    # shift_ref: (Cout, 1)   f32 folded BN shift = beta - mean * scale
    # o_ref:     (Cout, TM)  f32 output tile (lane-dense)
    acc = jnp.dot(w_ref[...], x_ref[...], preferred_element_type=jnp.float32)
    o_ref[...] = jnp.maximum(acc + shift_ref[...], 0.0).astype(o_ref.dtype)


def _im2col_t(x, kh, kw, stride, padding, dilation):
    # x: (N, C, H, W) -> cols_T: (C*KH*KW, N*OH*OW).
    # Row ordering is c-major, then kh, then kw, matching
    # torch weight.reshape(Cout, C*KH*KW).
    n, c, h, w = x.shape
    xp = jnp.pad(x, ((0, 0), (0, 0), (padding, padding), (padding, padding)))
    hp, wp = h + 2 * padding, w + 2 * padding
    oh = (hp - dilation * (kh - 1) - 1) // stride + 1
    ow = (wp - dilation * (kw - 1) - 1) // stride + 1
    patches = []
    for i in range(kh):
        for j in range(kw):
            r0 = i * dilation
            c0 = j * dilation
            patches.append(
                xp[:, :, r0:r0 + (oh - 1) * stride + 1:stride,
                         c0:c0 + (ow - 1) * stride + 1:stride])   # (N, C, OH, OW)
    cols = jnp.stack(patches, axis=2)            # (N, C, KH*KW, OH, OW)
    cols = cols.transpose(1, 2, 0, 3, 4)         # (C, KH*KW, N, OH, OW)
    cols = cols.reshape(c * kh * kw, n * oh * ow)
    return cols, oh, ow


def _pick_tm(m, k_dim, cout, budget_bytes=16 << 20):
    # Bytes per unit of TM resident in VMEM: double-buffered bf16 patch block
    # plus double-buffered f32 output block (weight/shift blocks are tiny).
    bytes_per_tm = 2 * (k_dim * 2) + 2 * (cout * 4)
    tm = (budget_bytes // bytes_per_tm) // 128 * 128
    tm = int(max(128, min(tm, 2048)))
    # Keep at least 2 grid steps when M allows (v7x has 2 TensorCores).
    if m > 128:
        tm = min(tm, max(128, pl.cdiv(m, 2 * 128) * 128))
    return tm


@functools.partial(jax.jit, static_argnames=("stride", "padding", "dilation"))
def basic_conv2d(x, weight, gamma, beta, running_mean, running_var,
                 stride=1, padding=0, dilation=1, eps=1e-5):
    """Conv2d(bias=False) + BatchNorm2d(eval) + ReLU.  x: (N, C, H, W)."""
    n, c, h, w = x.shape
    cout, cin, kh, kw = weight.shape
    assert cin == c, "groups != 1 not supported"  # TODO(synk): grouped conv

    k_dim = c * kh * kw

    # Fold BN: scale = gamma / sqrt(var + eps) goes into the weight rows,
    # shift = beta - mean * scale stays as the kernel epilogue bias.
    inv_std = 1.0 / jnp.sqrt(running_var.astype(jnp.float32) + eps)
    scale = gamma.astype(jnp.float32) * inv_std                       # (Cout,)
    shift = (beta.astype(jnp.float32)
             - running_mean.astype(jnp.float32) * scale).reshape(cout, 1)
    w_mat = (weight.reshape(cout, k_dim).astype(jnp.float32)
             * scale[:, None]).astype(jnp.bfloat16)                   # (Cout, K)

    # im2col in bf16 (halves HBM traffic of the dominant patch stream).
    cols, oh, ow = _im2col_t(x.astype(jnp.bfloat16), kh, kw,
                             stride, padding, dilation)               # (K, M)
    m = cols.shape[1]

    tm = _pick_tm(m, k_dim, cout)
    m_pad = pl.cdiv(m, tm) * tm
    if m_pad != m:
        cols = jnp.pad(cols, ((0, 0), (0, m_pad - m)))

    out_t = pl.pallas_call(
        _conv_bn_relu_kernel,
        out_shape=jax.ShapeDtypeStruct((cout, m_pad), jnp.float32),
        grid_spec=pltpu.PrefetchScalarGridSpec(
            num_scalar_prefetch=0,
            grid=(m_pad // tm,),
            in_specs=[
                pl.BlockSpec((k_dim, tm), lambda i: (0, i)),
                pl.BlockSpec((cout, k_dim), lambda i: (0, 0)),
                pl.BlockSpec((cout, 1), lambda i: (0, 0)),
            ],
            out_specs=pl.BlockSpec((cout, tm), lambda i: (0, i)),
        ),
        compiler_params=pltpu.CompilerParams(
            dimension_semantics=("parallel",),
            vmem_limit_bytes=32 * 1024 * 1024,
        ),
    )(cols, w_mat, shift)

    out_t = out_t[:, :m]                                          # drop M padding
    out = out_t.reshape(cout, n, oh, ow).transpose(1, 0, 2, 3)    # -> NCHW
    return out


if __name__ == "__main__":
    # BasicConv2d(in_planes=4, out_planes=8, kernel_size=3, stride=1, padding=1)
    N, C_IN, H, W = 2, 4, 16, 16
    C_OUT, KSZ, STRIDE, PAD = 8, 3, 1, 1

    key = jax.random.PRNGKey(0)
    kx, kw_, kg, kb, km, kv = jax.random.split(key, 6)

    x = jax.random.normal(kx, (N, C_IN, H, W), dtype=jnp.float32)
    weight = jax.random.normal(kw_, (C_OUT, C_IN, KSZ, KSZ), dtype=jnp.float32) * 0.1
    gamma = 1.0 + 0.1 * jax.random.normal(kg, (C_OUT,), dtype=jnp.float32)
    beta = 0.1 * jax.random.normal(kb, (C_OUT,), dtype=jnp.float32)
    running_mean = 0.1 * jax.random.normal(km, (C_OUT,), dtype=jnp.float32)
    running_var = jnp.abs(1.0 + 0.1 * jax.random.normal(kv, (C_OUT,), dtype=jnp.float32))

    out = basic_conv2d(x, weight, gamma, beta, running_mean, running_var,
                       stride=STRIDE, padding=PAD, dilation=1)
    out = jax.block_until_ready(out)

    # Pure-JAX f32 reference (same semantics as PyTorch eval-mode forward).
    conv_ref = jax.lax.conv_general_dilated(
        x, weight, window_strides=(STRIDE, STRIDE),
        padding=[(PAD, PAD), (PAD, PAD)],
        dimension_numbers=("NCHW", "OIHW", "NCHW"),
        precision=jax.lax.Precision.HIGHEST)
    inv_std = 1.0 / jnp.sqrt(running_var + 1e-5)
    ref = (conv_ref - running_mean[None, :, None, None]) \
          * (gamma * inv_std)[None, :, None, None] + beta[None, :, None, None]
    ref = jnp.maximum(ref, 0.0)

    assert out.shape == (N, C_OUT, H, W)
    # bf16 matmul inputs -> slightly looser tolerance vs. the exact f32 reference.
    assert jnp.allclose(out, ref, rtol=2e-2, atol=2e-2), float(jnp.max(jnp.abs(out - ref)))
    print("KERNEL_OK")
</pallas_src>

<mosaic_0001>
module attributes {stable_mosaic.version = 11 : i64} {
  func.func @_conv_bn_relu_kernel(%arg0: i32, %arg1: memref<36x256xbf16, #tpu.memory_space<vmem>>, %arg2: memref<8x36xbf16, #tpu.memory_space<vmem>>, %arg3: memref<8x1xf32, #tpu.memory_space<vmem>>, %arg4: memref<8x256xf32, #tpu.memory_space<vmem>>) attributes {dimension_semantics = [#tpu.dimension_semantics<parallel>], iteration_bounds = array<i64: 2>, scalar_prefetch = 0 : i64, scratch_operands = 0 : i64, tpu.core_type = #tpu.core_type<tc>, window_params = [{transform_indices = @transform_0, window_bounds = array<i64: 36, 256>}, {pipeline_mode = #tpu.pipeline_mode<synchronous>, transform_indices = @transform_1, window_bounds = array<i64: 8, 36>}, {pipeline_mode = #tpu.pipeline_mode<synchronous>, transform_indices = @transform_2, window_bounds = array<i64: 8, 1>}, {transform_indices = @transform_3, window_bounds = array<i64: 8, 256>}]} {
    %c0 = arith.constant 0 : index
    %c0_0 = arith.constant 0 : index
    %0 = vector.load %arg2[%c0, %c0_0] : memref<8x36xbf16, #tpu.memory_space<vmem>>, vector<8x36xbf16>
    %c0_1 = arith.constant 0 : index
    %c0_2 = arith.constant 0 : index
    %1 = vector.load %arg1[%c0_1, %c0_2] : memref<36x256xbf16, #tpu.memory_space<vmem>>, vector<36x256xbf16>
    %cst = arith.constant dense<0.000000e+00> : vector<8x256xf32>
    %2 = tpu.matmul %0, %1, %cst {dimension_numbers = #tpu.dot_dimension_numbers<[1], [0], [0], [1], [0, 0, 1, 1], [], []>} : vector<8x36xbf16>, vector<36x256xbf16>, vector<8x256xf32> -> vector<8x256xf32>
    %c0_3 = arith.constant 0 : index
    %c0_4 = arith.constant 0 : index
    %3 = vector.load %arg3[%c0_3, %c0_4] : memref<8x1xf32, #tpu.memory_space<vmem>>, vector<8x1xf32>
    %4 = vector.broadcast %3 : vector<8x1xf32> to vector<8x256xf32>
    %5 = arith.addf %2, %4 : vector<8x256xf32>
    %cst_5 = arith.constant 0.000000e+00 : f32
    %6 = vector.broadcast %cst_5 : f32 to vector<8x256xf32>
    %7 = arith.maximumf %5, %6 : vector<8x256xf32>
    %c0_6 = arith.constant 0 : index
    %c0_7 = arith.constant 0 : index
    %8 = vector.load %arg4[%c0_6, %c0_7] : memref<8x256xf32, #tpu.memory_space<vmem>>, vector<8x256xf32>
    tpu.vector_store %arg4[%c0_6, %c0_7], %7 {strides = array<i32>} : memref<8x256xf32, #tpu.memory_space<vmem>>, vector<8x256xf32>,
    return
  }
  func.func @transform_0(%arg0: i32) -> (i32, i32) {
    %c0_i32 = arith.constant 0 : i32
    %c0_i32_0 = arith.constant 0 : i32
    return %c0_i32, %arg0 : i32, i32
  }
  func.func @transform_1(%arg0: i32) -> (i32, i32) {
    %c0_i32 = arith.constant 0 : i32
    %c0_i32_0 = arith.constant 0 : i32
    %c0_i32_1 = arith.constant 0 : i32
    return %c0_i32, %c0_i32_0 : i32, i32
  }
  func.func @transform_2(%arg0: i32) -> (i32, i32) {
    %c0_i32 = arith.constant 0 : i32
    %c0_i32_0 = arith.constant 0 : i32
    %c0_i32_1 = arith.constant 0 : i32
    return %c0_i32, %c0_i32_0 : i32, i32
  }
  func.func @transform_3(%arg0: i32) -> (i32, i32) {
    %c0_i32 = arith.constant 0 : i32
    %c0_i32_0 = arith.constant 0 : i32
    return %c0_i32, %arg0 : i32, i32
  }
}

</mosaic_0001>

<bundles_post_ra>
// kernel: basic_conv2d.1
= control target key start
LH: loop header
LB: loop body
LE: loop exit
PB: predicated region body
PF: predicated region fallthrough
CT: control target
= control target key end

     0   :  { %s482_s12 = smov 0   ;;  %s484_s13 = smov 0   ;;  %s540_s0 = inlined_call_operand.vmem [shape: bf16[36,512], index: 0, kind: input, shape index: {}]   ;;  %s541_s1 = inlined_call_operand.vmem [shape: bf16[8,36], index: 1, kind: input, shape index: {}]   ;;  %s542_s2 = inlined_call_operand.vmem [shape: f32[8,1], index: 2, kind: input, shape index: {}]   ;;  %s543_s3 = inlined_call_operand.vmem [shape: f32[8,512], index: 3, kind: output, shape index: {}]  }
   0x1   :  { %s486_s14 = smov 0  }
   0x2 LB: > { %s381_s15 = sadd.s32 4294967295, %s459_s14   ;;  %s499_s16 = sadd.s32 1, %s459_s14   ;;  %s459_s14 = sphi %s486_s14, %s546_s14   ;;  %s455_s13 = sphi %s484_s13, %s545_s13   ;;  %s451_s12 = sphi %s482_s12, %s544_s12  }
   0x3   : > { %s17_s17 = ssub.s32 %s459_s14, %s499_s16  ;;  %s20_s18 = sadd.s32 1, %s455_s13 }
   0x4   : > { %p18_p0 = scmp.eq.s32.totalorder %s17_s17, 0  ;;  %p27_p1 = scmp.ne.s32.totalorder %s455_s13, %s451_s12 }
   0x5   : > { %p28_p2 = scmp.eq.s32.totalorder %s459_s14, 0  ;;  %p384_p4 = scmp.ge.s32.totalorder %s459_s14, 2 }
   0x6   : > { %s508_s19 = scalar_select %p18_p0, %s455_s13, %s20_s18  }
   0x7   : > { %p29_p3 = por %p28_p2, %p27_p1  ;;  %127 = sbr.rel (%p384_p4) target bundleno = 19 (0x13), region = 24 }
   0xc   : > { %130 = sbr.rel (!%p29_p3) target bundleno = 19 (0x13), region = 28  ;;  %s132_s20 = sand.u32 (%p29_p3), 1, %s455_s13  }
   0xd   : > { %s400_s21 = sshll.u32 (%p29_p3), %s459_s14, 3  ;;  %s401_s22 = smul.u32 (%p29_p3), 40, %s132_s20 }
   0xe   : > { %s137_s25 = scalar_lea.vmem (%p29_p3), %s540_s0, %s400_s21 }
   0xf   : > { %v174_v0 = vld [vmem:[%s137_s25] sm:$0xff] (%p29_p3)  ;;  %v176_v1 = vld [vmem:[%s137_s25 + $0x10] sm:$0xff] (%p29_p3)  ;;  %s134_s26 = scalar_lea.vmem (%p29_p3), [#allocation2], %s401_s22 }
  0x10   : > { %v178_v2 = vld [vmem:[%s137_s25 + $0x20] sm:$0xff] (%p29_p3)  ;;  %v180_v3 = vld [vmem:[%s137_s25 + $0x30] sm:$0xff] (%p29_p3)  ;;  %175 = vst [vmem:[%s134_s26] sm:$0xff] (%p29_p3), %v174_v0  ;;  %177 = vst [vmem:[%s134_s26 + $0x8] sm:$0xff] (%p29_p3), %v176_v1 }
  0x11   : > { %v182_v4 = vld [vmem:[%s137_s25 + $0x40] sm:$0xff]  ;;  %179 = vst [vmem:[%s134_s26 + $0x10] sm:$0xff] %v178_v2  ;;  %181 = vst [vmem:[%s134_s26 + $0x18] sm:$0xff] %v180_v3 }
  0x12   : > { %183 = vst [vmem:[%s134_s26 + $0x20] sm:$0xff] %v182_v4 }
  0x13 PF: > { %p387_p5 = scmp.ge.s32.totalorder %s459_s14, 1  ;;  %p188_p6 = scmp.lt.s32.totalorder %s459_s14, 3 }
  0x15   : > { %p189_p7 = pnand %p387_p5, %p188_p6 }
  0x16   : > { %s195_s27 = sand.u32 (!%p189_p7), 1, %s451_s12   ;;  %s388_s7 = sshll.u32 (!%p189_p7), %s381_s15, 1 }
  0x17   : > { %192 = sbr.rel (%p189_p7) target bundleno = 244 (0xf4), region = 66  ;;  %p220_p8 = scmp.lt.s32.totalorder (!%p189_p7), %s388_s7, 3 }
  0x18   : > { %s402_s28 = smul.u32 (!%p189_p7), 40, %s195_s27 }
  0x1a   : > { %s197_s4 = scalar_lea.vmem (!%p189_p7), [#allocation2], %s402_s28 }
  0x1c   : > { %v461_v5 = vmov 0   ;;  %v232_v6 = vld [vmem:[%s542_s2] sm:$0xff]  ;;  %vm267_vm0 = vcmask 1041408   ;;  %vm263_vm1 = vcmask 293888   ;;  %s548_s7 = smov (!%p220_p8, %s388_s7), 3 }
  0x1d   : > { %306 = vmatprep.mubr.bf16.mxu0 %v461_v5  ;;  %428 = vset.pattern.permute.xlu0 %v461_v5  ;;  %v231_v7 = vld [vmem:[%s197_s4 + $0x20] sm:$0x33]  ;;  %v431_v10 = vld [vmem:[%s197_s4 + $0x14] ss:$8 sps:$4 sm:$0xff]   ;;  %v433_v12 = vld [vmem:[%s197_s4 + $0x10] ss:$8 sps:$4 sm:$0xff]  }
  0x1e   : > { %235 = vperm.xlu0 %428, %v232_v6   ;;  %v395_v8 = vcombine.high %v231_v7, %v231_v7  ;;  %v394_v9 = vcombine.low %v231_v7, %v231_v7  ;;  %v434_v13 = vld [vmem:[%s197_s4 + $0x4] ss:$8 sps:$4 sm:$0xff]   ;;  %v436_v14 = vld [vmem:[%s197_s4] ss:$8 sps:$4 sm:$0xff]   ;;  %s389_s8 = sshll.u32 %s548_s7, 3 }
  0x1f   : > { %v226_v15 = vld [vmem:[%s541_s1] sm:$0xf]  ;;  %s223_s11 = scalar_lea.vmem %s543_s3, %s389_s8 }
  0x20   : > { %396 = vmatprep.subr.msk.bf16.mxu0 %vm267_vm0, %v395_v8  ;;  %v269_v11 = vsel %vm267_vm0, %v394_v9, 0 }
  0x21   : > { %285 = vmatpush1.bf16.msra.mxu0 %v269_v11 }
  0x22   : > { %286 = vmatprep.subr.bf16.mxu0 %v431_v10 }
  0x25   : > { %287 = vmatpush1.bf16.msra.mxu0 %v433_v12 }
  0x26   : > { %288 = vmatprep.subr.bf16.mxu0 %v434_v13 }
  0x29   : > { %289 = vmatpush1.bf16.msra.mxu0 %v436_v14 }
  0x2c   : > { %397 = vmatmul.mubr.msk.bf16.vlgmr.msra.gmra.mxu0 %vm263_vm1, %v226_v15 }
  0x99   : > { %v236_v16 = vpop.permute.xlu0 %235 }
  0xec   : > { %v308_v17 = vpop.f32.mrf.mxu0 }
  0xed   : > { %v309_v18 = vadd.f32 %v308_v17, %v236_v16 }
  0xee   : > { %v310_v19 = vpop.f32.mrf.mxu0 }
  0xef   : > { %v315_v20 = vmax.f32 %v309_v18, 0.0  ;;  %v311_v21 = vadd.f32 %v310_v19, %v236_v16 }
  0xf0   : > { %v312_v22 = vpop.f32.mrf.mxu0 }
  0xf1   : > { %317 = vst [vmem:[%s223_s11] sm:$0xff] %v315_v20  ;;  %v316_v23 = vmax.f32 %v311_v21, 0.0 }
  0xf2   : > { %v313_v24 = vpop.f32.mrf.mxu0 }
  0xf3   : > { %318 = vst [vmem:[%s223_s11 + $0x8] sm:$0xff] %v316_v23 }
  0xf4 PF: > { %p10_p9 = scmp.ge.s32.totalorder %s499_s16, 4   ;;  %s544_s12 = smov %s455_s13 }
  0xf5   : > { %s545_s13 = smov %s508_s19  ;;  %s546_s14 = smov %s499_s16 }
  0xf6   :  { %12 = sbr.rel (!%p10_p9) target bundleno = 2 (0x2), region = 105 }

</bundles_post_ra>
